<compile_context>
chip_gen: v7x
topology: tpu7x:2x2x1
jax: 0.10.0
libtpu: 0.0.40
codegen_flags: <defaults>
</compile_context>

<pallas_src>
import functools

import jax
import jax.numpy as jnp
import numpy as np
from jax.experimental import pallas as pl
from jax.experimental.pallas import tpu as pltpu


# ----------------------------------------------------------------------------
# Kernel: per-sample standardize + min-max rescale (fused)
# ----------------------------------------------------------------------------
def _normalize_melspec_kernel(x_ref, o_ref, *, eps, inv_n, inv_nm1):
    x = x_ref[0].astype(jnp.float32)                                   # (M, T)

    # mean over the whole sample
    mean = jnp.sum(x, axis=(0, 1), keepdims=True) * inv_n              # (1, 1)
    centered = x - mean

    # unbiased std (matches torch.Tensor.std default, divisor N-1)
    var = jnp.sum(centered * centered, axis=(0, 1), keepdims=True) * inv_nm1
    std = jnp.sqrt(var)                                                # (1, 1)
    xstd = centered * (1.0 / (std + eps))                              # (M, T)

    # per-sample min / max of the standardized spectrogram
    nmin = jnp.min(xstd, axis=(0, 1), keepdims=True)                   # (1, 1)
    nmax = jnp.max(xstd, axis=(0, 1), keepdims=True)                   # (1, 1)
    rng = nmax - nmin
    fix = rng > eps                                                    # (1, 1) bool

    inv_rng = 1.0 / jnp.where(fix, rng, 1.0)                           # safe reciprocal
    v = jnp.maximum(jnp.minimum(xstd, nmax), nmin)                     # torch clamp order
    v = (v - nmin) * inv_rng
    o_ref[0] = jnp.where(fix, v, 0.0).astype(o_ref.dtype)              # zeros if degenerate


# ----------------------------------------------------------------------------
# Wrapper
# ----------------------------------------------------------------------------
def normalize_melspec(x, eps=1e-6):
    """x: (B, M, T) mel spectrogram. Returns per-sample [0,1]-normalized spectrogram."""
    B, M, T = x.shape
    n = M * T
    kernel = functools.partial(
        _normalize_melspec_kernel,
        eps=float(eps),
        inv_n=1.0 / n,
        inv_nm1=1.0 / max(n - 1, 1),
    )

    # in + out blocks, double-buffered, plus headroom; never below compiler default,
    # capped at 64 MiB so it stays within v7x physical VMEM.
    blk_bytes = M * T * 4
    vmem_limit = int(min(64 * 2**20, max(32 * 2**20, 6 * blk_bytes)))

    return pl.pallas_call(
        kernel,
        out_shape=jax.ShapeDtypeStruct((B, M, T), jnp.float32),
        grid=(B,),
        in_specs=[pl.BlockSpec((1, M, T), lambda b: (b, 0, 0))],
        out_specs=pl.BlockSpec((1, M, T), lambda b: (b, 0, 0)),
        compiler_params=pltpu.CompilerParams(
            dimension_semantics=("parallel",),      # samples are independent -> both v7x TCs
            vmem_limit_bytes=vmem_limit,
        ),
    )(x.astype(jnp.float32))


# ----------------------------------------------------------------------------
# Pure-JAX reference (same math as the PyTorch module) for validation
# ----------------------------------------------------------------------------
def reference_forward(x, eps=1e-6):
    x = x.astype(jnp.float32)
    B, M, T = x.shape
    n = M * T
    mean = jnp.mean(x, axis=(1, 2), keepdims=True)
    var = jnp.sum((x - mean) ** 2, axis=(1, 2), keepdims=True) / max(n - 1, 1)
    std = jnp.sqrt(var)
    xstd = (x - mean) / (std + eps)
    nmin = jnp.min(xstd, axis=(1, 2), keepdims=True)
    nmax = jnp.max(xstd, axis=(1, 2), keepdims=True)
    rng = nmax - nmin
    fix = rng > eps
    v = jnp.maximum(jnp.minimum(xstd, nmax), nmin)
    v = (v - nmin) / jnp.where(fix, rng, 1.0)
    return jnp.where(fix, v, 0.0)


if __name__ == "__main__":
    key = jax.random.PRNGKey(0)
    B, M, T = 2, 64, 128                               # (batch, n_mels, time frames)

    x = jax.random.normal(key, (B, M, T), jnp.float32) * 3.0 + 1.5
    # make sample 1 constant to exercise the "range <= eps -> all zeros" branch
    x = x.at[1].set(0.7)

    out = jax.jit(normalize_melspec)(x)
    out = jax.block_until_ready(out)

    ref = reference_forward(x)
    assert out.shape == (B, M, T), out.shape
    assert np.allclose(np.asarray(out), np.asarray(ref), atol=1e-4, rtol=1e-4), (
        float(np.max(np.abs(np.asarray(out) - np.asarray(ref)))))
    # normalized sample lies in [0, 1]; degenerate (constant) sample is exactly zero
    assert float(jnp.min(out[0])) >= 0.0 and float(jnp.max(out[0])) <= 1.0
    assert float(jnp.max(jnp.abs(out[1]))) == 0.0
    print("KERNEL_OK")
</pallas_src>

<mosaic_0001>
module attributes {stable_mosaic.version = 11 : i64} {
  func.func @_normalize_melspec_kernel(%arg0: i32, %arg1: memref<1x64x128xf32, #tpu.memory_space<vmem>>, %arg2: memref<1x64x128xf32, #tpu.memory_space<vmem>>) attributes {dimension_semantics = [#tpu.dimension_semantics<parallel>], iteration_bounds = array<i64: 2>, scalar_prefetch = 0 : i64, scratch_operands = 0 : i64, tpu.core_type = #tpu.core_type<tc>, window_params = [{transform_indices = @transform_0, window_bounds = array<i64: 1, 64, 128>}, {transform_indices = @transform_1, window_bounds = array<i64: 1, 64, 128>}]} {
    %c0 = arith.constant 0 : index
    %c0_0 = arith.constant 0 : index
    %c0_1 = arith.constant 0 : index
    %0 = vector.load %arg1[%c0, %c0_0, %c0_1] : memref<1x64x128xf32, #tpu.memory_space<vmem>>, vector<1x64x128xf32>
    %1 = vector.shape_cast %0 : vector<1x64x128xf32> to vector<64x128xf32>
    %2 = vector.shape_cast %1 : vector<64x128xf32> to vector<1x64x128xf32>
    %cst = arith.constant dense<0.000000e+00> : vector<1xf32>
    %3 = vector.multi_reduction <add>, %2, %cst [1, 2] : vector<1x64x128xf32> to vector<1xf32>
    %4 = vector.shape_cast %3 : vector<1xf32> to vector<1x1x1xf32>
    %5 = vector.extract %4[0, 0, 0] : f32 from vector<1x1x1xf32>
    %6 = vector.broadcast %5 : f32 to vector<1x1xf32>
    %cst_2 = arith.constant 1.22070313E-4 : f32
    %7 = vector.broadcast %cst_2 : f32 to vector<1x1xf32>
    %8 = arith.mulf %6, %7 : vector<1x1xf32>
    %9 = vector.broadcast %8 : vector<1x1xf32> to vector<64x128xf32>
    %10 = arith.subf %1, %9 : vector<64x128xf32>
    %11 = arith.mulf %10, %10 : vector<64x128xf32>
    %12 = vector.shape_cast %11 : vector<64x128xf32> to vector<1x64x128xf32>
    %cst_3 = arith.constant dense<0.000000e+00> : vector<1xf32>
    %13 = vector.multi_reduction <add>, %12, %cst_3 [1, 2] : vector<1x64x128xf32> to vector<1xf32>
    %14 = vector.shape_cast %13 : vector<1xf32> to vector<1x1x1xf32>
    %15 = vector.extract %14[0, 0, 0] : f32 from vector<1x1x1xf32>
    %16 = vector.broadcast %15 : f32 to vector<1x1xf32>
    %cst_4 = arith.constant 1.22085214E-4 : f32
    %17 = vector.broadcast %cst_4 : f32 to vector<1x1xf32>
    %18 = arith.mulf %16, %17 : vector<1x1xf32>
    %19 = math.sqrt %18 : vector<1x1xf32>
    %cst_5 = arith.constant 9.99999997E-7 : f32
    %20 = vector.broadcast %cst_5 : f32 to vector<1x1xf32>
    %21 = arith.addf %19, %20 : vector<1x1xf32>
    %cst_6 = arith.constant 1.000000e+00 : f32
    %22 = vector.broadcast %cst_6 : f32 to vector<1x1xf32>
    %23 = arith.divf %22, %21 : vector<1x1xf32>
    %24 = vector.broadcast %23 : vector<1x1xf32> to vector<64x128xf32>
    %25 = arith.mulf %10, %24 : vector<64x128xf32>
    %26 = vector.shape_cast %25 : vector<64x128xf32> to vector<1x64x128xf32>
    %cst_7 = arith.constant dense<0x7F800000> : vector<1xf32>
    %27 = vector.multi_reduction <minimumf>, %26, %cst_7 [1, 2] : vector<1x64x128xf32> to vector<1xf32>
    %28 = vector.shape_cast %27 : vector<1xf32> to vector<1x1x1xf32>
    %29 = vector.extract %28[0, 0, 0] : f32 from vector<1x1x1xf32>
    %30 = vector.broadcast %29 : f32 to vector<1x1xf32>
    %31 = vector.shape_cast %25 : vector<64x128xf32> to vector<1x64x128xf32>
    %cst_8 = arith.constant dense<0xFF800000> : vector<1xf32>
    %32 = vector.multi_reduction <maximumf>, %31, %cst_8 [1, 2] : vector<1x64x128xf32> to vector<1xf32>
    %33 = vector.shape_cast %32 : vector<1xf32> to vector<1x1x1xf32>
    %34 = vector.extract %33[0, 0, 0] : f32 from vector<1x1x1xf32>
    %35 = vector.broadcast %34 : f32 to vector<1x1xf32>
    %36 = arith.subf %35, %30 : vector<1x1xf32>
    %cst_9 = arith.constant 9.99999997E-7 : f32
    %37 = vector.broadcast %cst_9 : f32 to vector<1x1xf32>
    %38 = arith.cmpf ogt, %36, %37 : vector<1x1xf32>
    %cst_10 = arith.constant 1.000000e+00 : f32
    %39 = vector.broadcast %cst_10 : f32 to vector<1x1xf32>
    %40 = arith.select %38, %36, %39 : vector<1x1xi1>, vector<1x1xf32>
    %cst_11 = arith.constant 1.000000e+00 : f32
    %41 = vector.broadcast %cst_11 : f32 to vector<1x1xf32>
    %42 = arith.divf %41, %40 : vector<1x1xf32>
    %43 = vector.broadcast %35 : vector<1x1xf32> to vector<64x128xf32>
    %44 = arith.minimumf %25, %43 : vector<64x128xf32>
    %45 = vector.broadcast %30 : vector<1x1xf32> to vector<64x128xf32>
    %46 = arith.maximumf %44, %45 : vector<64x128xf32>
    %47 = vector.broadcast %30 : vector<1x1xf32> to vector<64x128xf32>
    %48 = arith.subf %46, %47 : vector<64x128xf32>
    %49 = vector.broadcast %42 : vector<1x1xf32> to vector<64x128xf32>
    %50 = arith.mulf %48, %49 : vector<64x128xf32>
    %cst_12 = arith.constant 0.000000e+00 : f32
    %51 = vector.shape_cast %38 : vector<1x1xi1> to vector<1x1xi1>
    %52 = vector.broadcast %51 : vector<1x1xi1> to vector<64x128xi1>
    %53 = vector.broadcast %cst_12 : f32 to vector<64x128xf32>
    %54 = arith.select %52, %50, %53 : vector<64x128xi1>, vector<64x128xf32>
    %c0_13 = arith.constant 0 : index
    %c0_14 = arith.constant 0 : index
    %c0_15 = arith.constant 0 : index
    %55 = vector.load %arg2[%c0_13, %c0_14, %c0_15] : memref<1x64x128xf32, #tpu.memory_space<vmem>>, vector<1x64x128xf32>
    %56 = vector.shape_cast %55 : vector<1x64x128xf32> to vector<64x128xf32>
    %57 = vector.shape_cast %54 : vector<64x128xf32> to vector<1x64x128xf32>
    tpu.vector_store %arg2[%c0_13, %c0_14, %c0_15], %57 {strides = array<i32>} : memref<1x64x128xf32, #tpu.memory_space<vmem>>, vector<1x64x128xf32>,
    return
  }
  func.func @transform_0(%arg0: i32) -> (i32, i32, i32) {
    %c0_i32 = arith.constant 0 : i32
    %c0_i32_0 = arith.constant 0 : i32
    %c0_i32_1 = arith.constant 0 : i32
    return %arg0, %c0_i32, %c0_i32_0 : i32, i32, i32
  }
  func.func @transform_1(%arg0: i32) -> (i32, i32, i32) {
    %c0_i32 = arith.constant 0 : i32
    %c0_i32_0 = arith.constant 0 : i32
    %c0_i32_1 = arith.constant 0 : i32
    return %arg0, %c0_i32, %c0_i32_0 : i32, i32, i32
  }
}

</mosaic_0001>

<bundles_post_ra>
// kernel: normalize_melspec.1
= control target key start
LH: loop header
LB: loop body
LE: loop exit
PB: predicated region body
PF: predicated region fallthrough
CT: control target
= control target key end

     0   :  { %6 = vsyncpa [#allocation3], 0  ;;  %s769_s0 = inlined_call_operand.hbm [shape: f32[2,64,128], index: 0, kind: input, shape index: {}]   ;;  %s770_s1 = inlined_call_operand.hbm [shape: f32[2,64,128], index: 1, kind: output, shape index: {}]  }
   0x1   :  { %8 = vsyncpa [#allocation3 + $0x1], 0 }
   0x2   :  { %9 = vsyncpa [#allocation4], 0 }
   0x3   :  { %11 = vsyncpa [#allocation4 + $0x1], 0  ;;  %s583_s6 = smov 0   ;;  %s585_s7 = smov 0  }
   0x4   :  { %s587_s8 = smov 0   ;;  %s589_s9 = smov 0  }
   0x5 LB: > { %s604_s10 = sadd.s32 4294967295, %s565_s9   ;;  %s389_s11 = sadd.s32 4294967294, %s565_s9   ;;  %s565_s9 = sphi %s589_s9, %s783_s9   ;;  %s561_s8 = sphi %s587_s8, %s782_s8   ;;  %s557_s7 = sphi %s585_s7, %s781_s7   ;;  %s553_s6 = sphi %s583_s6, %s780_s6  }
   0x6   : > { %s608_s12 = sadd.s32 1, %s565_s9   ;;  %s24_s13 = sadd.s32 1, %s561_s8 }
   0x7   : > { %s21_s14 = ssub.s32 %s565_s9, %s608_s12  ;;  %p31_p0 = scmp.ne.s32.totalorder %s561_s8, %s557_s7 }
   0x8   : > { %p22_p1 = scmp.eq.s32.totalorder %s21_s14, 0  ;;  %p32_p2 = scmp.eq.s32.totalorder %s565_s9, 0 }
   0x9   : > { %p37_p3 = scmp.ne.s32.totalorder %s557_s7, %s553_s6  ;;  %p38_p4 = scmp.eq.s32.totalorder %s604_s10, 0 }
   0xa   : > { %s620_s15 = scalar_select %p22_p1, %s561_s8, %s24_s13  }
   0xb   : > { %p622_p5 = por %p32_p2, %p31_p0  ;;  %p626_p6 = por %p38_p4, %p37_p3 }
   0xc   : > { %p61_p7 = scmp.eq.s32.totalorder %s604_s10, 1  ;;  %p67_p8 = scmp.eq.s32.totalorder %s389_s11, 1 }
   0xd   : > { %p425_p10 = scmp.lt.s32.totalorder %s565_s9, 2  ;;  %s87_s20 = sand.u32 1, %s561_s8  }
   0xe   : > { %p633_p11 = por %p61_p7, %p31_p0  ;;  %p637_p12 = por %p67_p8, %p37_p3 }
   0xf   : > { %s403_s21 = sshll.u32 %s565_s9, 10  ;;  %s392_s22 = sshll.u32 %s87_s20, 6 }
  0x10   : > { %s774_s18 = scalar_select %p633_p11, 1, 0 }
  0x11   : > { %s775_s19 = scalar_select %p637_p12, 1, 0 }
  0x12   : > { %s646_s25 = scalar_lea.hbm %s769_s0, %s403_s21  ;;  %s91_s26 = scalar_lea.vmem [#allocation2], %s392_s22 }
  0x13   : > { %s98_s27 = sshll.u32 %s91_s26, 4  ;;  %p650_p13 = pnand %p425_p10, %p622_p5  ;;  %s654_s27 = int_to_ptr.vmem [resolvable:$true] %s98_s27 }
  0x14   : > { %s656_s29 = scalar_lea.sflag [#allocation3], %s87_s20  ;;  %s469_s30 = scalar_lea.hbm %s646_s25, 1024 }
  0x15   : > { %p470_p0 = scmp.ne.s32.totalorder %s646_s25, %s469_s30  ;;  %p471_p1 = pneg %p650_p13 }
  0x16   : > { %s474_s4 = scalar_lea.hbm %s769_s0, 2048  ;;  %p475_p4 = scmp.lt.u32.totalorder %s646_s25, %s769_s0 }
  0x17   : > { %p472_p2 = pnand %p471_p1, %p470_p0  ;;  %p476_p5 = scmp.lt.u32.totalorder %s474_s4, %s469_s30 }
  0x18   : > { %p478_p8 = scmp.lt.u32.totalorder %s469_s30, %s646_s25 }
  0x19   : > { %p473_p3 = pneg %p472_p2  ;;  %p477_p7 = por %p476_p5, %p475_p4 }
  0x1b   : > { %p479_p10 = por %p478_p8, %p477_p7 }
  0x1d   : > { %p480_p9 = pnand %p479_p10, %p473_p3 }
  0x1f   : > { %483 = shalt.err (!%p480_p9)
}
  0x20   : > { %s484_s13 = scalar_lea.vmem %s654_s27, 1024  ;;  %s567_s14 = smov [#allocation2]  }
  0x21   : > { %p485_p0 = scmp.ne.s32.totalorder %s654_s27, %s484_s13  ;;  %s489_s16 = sshll.u32 %s567_s14, 4  ;;  %s490_s16 = int_to_ptr.vmem [resolvable:$false] %s489_s16 }
  0x22   : > { %s491_s20 = scalar_lea.vmem %s490_s16, 2048  ;;  %p492_p11 = scmp.lt.s32.totalorder %s654_s27, %s490_s16 }
  0x23   : > { %p487_p2 = pnand %p485_p0, %p471_p1  ;;  %p493_p4 = scmp.lt.s32.totalorder %s491_s20, %s484_s13 }
  0x25   : > { %p488_p12 = pneg %p487_p2  ;;  %p494_p5 = por %p493_p4, %p492_p11 }
  0x27   : > { %p495_p7 = pnand %p494_p5, %p488_p12 }
  0x29   : > { %498 = shalt.err (!%p495_p7)
}
  0x2a   : > { %s568_s21 = smov 128   ;;  %s569_s22 = smov 8  }
  0x2b   : > { %420 = dma.hbm_to_vmem [thread:$0]  (!%p650_p13), %s646_s25, 1024, %s654_s27, %s656_s29, %s568_s21, %s568_s21, %s569_s22  }
  0x2c   : > { %p395_p9 = scmp.ge.s32.totalorder %s565_s9, 1  ;;  %p106_p1 = scmp.lt.s32.totalorder %s565_s9, 3 }
  0x2e   : > { %p107_p3 = pnand %p395_p9, %p106_p1 }
  0x2f   : > { %s687_s23 = sand.u32 (!%p107_p3), 1, %s557_s7  }
  0x30   : > { %110 = sbr.rel (%p107_p3) target bundleno = 785 (0x311), region = 24  ;;  %s396_s24 = sshll.u32 (!%p107_p3), %s687_s23, 6 }
  0x31   : > { %s113_s26 = scalar_lea.sflag (!%p107_p3), [#allocation3], %s687_s23  ;;  %s116_s30 = scalar_lea.vmem (!%p107_p3), [#allocation2], %s396_s24 }
  0x37   : > { %544 = dma.done.wait (%p626_p6), %s113_s26, 1024  }
  0x38   : > { %546 = vsyncadd (%p626_p6), %s113_s26, 4294966272  ;;  %v135_v0 = vld [vmem:[%s116_s30] sm:$0xff]  ;;  %v136_v1 = vld [vmem:[%s116_s30 + $0x8] sm:$0xff]  ;;  %s404_s29 = sshll.u32 %s604_s10, 10  ;;  %s701_s2 = scalar_lea.vmem [#allocation5], %s396_s24 }
  0x39   : > { %v137_v2 = vld [vmem:[%s116_s30 + $0x10] sm:$0xff]  ;;  %v143_v3 = vadd.f32 %v136_v1, %v135_v0  ;;  %v138_v4 = vld [vmem:[%s116_s30 + $0x18] sm:$0xff]  ;;  %v139_v6 = vld [vmem:[%s116_s30 + $0x20] sm:$0xff]  ;;  %s316_s3 = sshll.u32 %s701_s2, 4  ;;  %s707_s5 = scalar_lea.hbm %s770_s1, %s404_s29  ;;  %s709_s3 = int_to_ptr.vmem [resolvable:$true] %s316_s3 }
  0x3a   : > { %v140_v8 = vld [vmem:[%s116_s30 + $0x28] sm:$0xff]  ;;  %v141_v10 = vld [vmem:[%s116_s30 + $0x30] sm:$0xff]  ;;  %v142_v12 = vld [vmem:[%s116_s30 + $0x38] sm:$0xff]  ;;  %s303_s11 = scalar_lea.sflag [#allocation4], %s687_s23  ;;  %s499_s13 = scalar_lea.vmem %s709_s3, 1024 }
  0x3b   : > { %v144_v5 = vadd.f32 %v143_v3, %v137_v2  ;;  %p500_p6 = scmp.ne.s32.totalorder %s709_s3, %s499_s13  ;;  %p777_p11 = scmp.ne.s32.totalorder %s774_s18, 0 }
  0x3c   : > { %s570_s14 = smov [#allocation5]  }
  0x3d   : > { %v145_v7 = vadd.f32 %v144_v5, %v138_v4  ;;  %p501_p12 = pnand %p500_p6, %p777_p11  ;;  %s503_s16 = sshll.u32 %s570_s14, 4  ;;  %s504_s16 = int_to_ptr.vmem [resolvable:$false] %s503_s16 }
  0x3e   : > { %s505_s20 = scalar_lea.vmem %s504_s16, 2048  ;;  %p506_p8 = scmp.lt.s32.totalorder %s709_s3, %s504_s16 }
  0x3f   : > { %v146_v9 = vadd.f32 %v145_v7, %v139_v6  ;;  %p502_p13 = pneg %p501_p12  ;;  %p507_p10 = scmp.lt.s32.totalorder %s505_s20, %s499_s13 }
  0x41   : > { %v147_v11 = vadd.f32 %v146_v9, %v140_v8  ;;  %p508_p0 = por %p507_p10, %p506_p8 }
  0x43   : > { %v148_v13 = vadd.f32 %v147_v11, %v141_v10  ;;  %p509_p2 = pnand %p508_p0, %p502_p13 }
  0x45   : > { %v149_v14 = vadd.f32 %v148_v13, %v142_v12 }
  0x47   : > { %150 = vadd.xlane.f32.xlu0 %v149_v14 }
  0xd4   : > { %v151_v15 = vpop.xlane.xlu0 %150 }
  0xd5   : > { %v152_v16 = vrot.slane %v151_v15, 4 }
  0xd7   : > { %v153_v17 = vadd.f32 %v152_v16, %v151_v15 }
  0xd9   : > { %v154_v18 = vrot.slane %v153_v17, 2 }
  0xdb   : > { %v155_v19 = vadd.f32 %v154_v18, %v153_v17 }
  0xdd   : > { %v156_v20 = vrot.slane %v155_v19, 1 }
  0xdf   : > { %v157_v21 = vadd.f32 %v156_v20, %v155_v19 }
  0xe1   : > { %405 = vpush %v157_v21 }
 0x112   : > { %s406_s17 = spop %405 }
 0x113   : > { %v159_v22 = vstv %s406_s17 }
 0x114   : > { %v160_v23 = vmul.f32 0.00012207031, %v159_v22 }
 0x116   : > { %v161_v24 = vsub.f32 %v135_v0, %v160_v23  ;;  %v162_v25 = vsub.f32 %v136_v1, %v160_v23  ;;  %v163_v26 = vsub.f32 %v137_v2, %v160_v23  ;;  %v164_v27 = vsub.f32 %v138_v4, %v160_v23 }
 0x117   : > { %v165_v30 = vsub.f32 %v139_v6, %v160_v23  ;;  %v166_v33 = vsub.f32 %v140_v8, %v160_v23  ;;  %v167_v36 = vsub.f32 %v141_v10, %v160_v23  ;;  %v168_v39 = vsub.f32 %v142_v12, %v160_v23 }
 0x118   : > { %v169_v28 = vmul.f32 %v161_v24, %v161_v24  ;;  %v170_v29 = vmul.f32 %v162_v25, %v162_v25  ;;  %v171_v31 = vmul.f32 %v163_v26, %v163_v26  ;;  %v172_v34 = vmul.f32 %v164_v27, %v164_v27 }
 0x119   : > { %v173_v37 = vmul.f32 %v165_v30, %v165_v30  ;;  %v174_v40 = vmul.f32 %v166_v33, %v166_v33  ;;  %v175_v42 = vmul.f32 %v167_v36, %v167_v36  ;;  %v176_v44 = vmul.f32 %v168_v39, %v168_v39 }
 0x11a   : > { %v177_v32 = vadd.f32 %v170_v29, %v169_v28 }
 0x11c   : > { %v178_v35 = vadd.f32 %v177_v32, %v171_v31 }
 0x11e   : > { %v179_v38 = vadd.f32 %v178_v35, %v172_v34 }
 0x120   : > { %v180_v41 = vadd.f32 %v179_v38, %v173_v37 }
 0x122   : > { %v181_v43 = vadd.f32 %v180_v41, %v174_v40 }
 0x124   : > { %v182_v45 = vadd.f32 %v181_v43, %v175_v42 }
 0x126   : > { %v183_v46 = vadd.f32 %v182_v45, %v176_v44 }
 0x128   : > { %184 = vadd.xlane.f32.xlu0 %v183_v46 }
 0x1b5   : > { %v185_v47 = vpop.xlane.xlu0 %184 }
 0x1b6   : > { %v186_v48 = vrot.slane %v185_v47, 4 }
 0x1b8   : > { %v187_v49 = vadd.f32 %v186_v48, %v185_v47 }
 0x1ba   : > { %v188_v50 = vrot.slane %v187_v49, 2 }
 0x1bc   : > { %v189_v51 = vadd.f32 %v188_v50, %v187_v49 }
 0x1be   : > { %v190_v52 = vrot.slane %v189_v51, 1 }
 0x1c0   : > { %v191_v53 = vadd.f32 %v190_v52, %v189_v51 }
 0x1c2   : > { %407 = vpush %v191_v53 }
 0x1f3   : > { %s408_s25 = spop %407 }
 0x1f4   : > { %v193_v54 = vstv %s408_s25 }
 0x1f5   : > { %v194_v55 = vmul.f32 0.00012208521, %v193_v54 }
 0x1f7   : > { %463 = vrsqrt.f32 %v194_v55  ;;  %vm197_vm0 = vcmp.eq.f32.partialorder %v194_v55, inf  ;;  %v200_v58 = vand.u32 2147483648, %v194_v55  ;;  %vm199_vm1 = vcmp.eq.f32.partialorder %v194_v55, 0.0 }
 0x201   : > { %v464_v56 = vpop.eup %463 }
 0x202   : > { %v196_v57 = vmul.f32 %v464_v56, %v194_v55 }
 0x204   : > { %v198_v59 = vsel %vm197_vm0, %v194_v55, %v196_v57 }
 0x205   : > { %v201_v60 = vsel %vm199_vm1, %v200_v58, %v198_v59 }
 0x206   : > { %v202_v61 = vadd.f32 1e-06, %v201_v60 }
 0x208   : > { %465 = vrcp.f32 %v202_v61 }
 0x212   : > { %v466_v62 = vpop.eup %465 }
 0x213   : > { %v205_v63 = vmul.f32 %v466_v62, %v161_v24  ;;  %v206_v0 = vmul.f32 %v466_v62, %v162_v25  ;;  %v207_v1 = vmul.f32 %v466_v62, %v163_v26  ;;  %v208_v2 = vmul.f32 %v466_v62, %v164_v27 }
 0x214   : > { %v209_v3 = vmul.f32 %v466_v62, %v165_v30  ;;  %v210_v4 = vmul.f32 %v466_v62, %v166_v33  ;;  %v211_v5 = vmul.f32 %v466_v62, %v167_v36  ;;  %v212_v6 = vmul.f32 %v466_v62, %v168_v39 }
 0x216   : > { %v213_v7 = vmin.f32 %v205_v63, %v209_v3  ;;  %v214_v8 = vmin.f32 %v206_v0, %v210_v4  ;;  %v215_v9 = vmin.f32 %v207_v1, %v211_v5  ;;  %v216_v10 = vmin.f32 %v208_v2, %v212_v6 }
 0x217   : > { %v230_v11 = vmax.f32 %v205_v63, %v209_v3  ;;  %v231_v12 = vmax.f32 %v206_v0, %v210_v4  ;;  %v232_v13 = vmax.f32 %v207_v1, %v211_v5  ;;  %v233_v14 = vmax.f32 %v208_v2, %v212_v6 }
 0x218   : > { %v217_v15 = vmin.f32 %v213_v7, %v214_v8  ;;  %v218_v16 = vmin.f32 %v215_v9, %v216_v10 }
 0x219   : > { %v234_v18 = vmax.f32 %v230_v11, %v231_v12  ;;  %v235_v19 = vmax.f32 %v232_v13, %v233_v14 }
 0x21a   : > { %v219_v17 = vmin.f32 %v217_v15, %v218_v16 }
 0x21b   : > { %v236_v20 = vmax.f32 %v234_v18, %v235_v19 }
 0x21c   : > { %220 = vmin.xlane.f32.xlu1 %v219_v17 }
 0x220   : > { %237 = vmax.xlane.f32.xlu1 %v236_v20 }
 0x2a9   : > { %v221_v21 = vpop.xlane.xlu1 %220 }
 0x2aa   : > { %v222_v22 = vrot.slane %v221_v21, 4 }
 0x2ac   : > { %v223_v23 = vmin.f32 %v221_v21, %v222_v22 }
 0x2ad   : > { %v238_v24 = vpop.xlane.xlu1 %237 }
 0x2ae   : > { %v224_v25 = vrot.slane %v223_v23, 2  ;;  %v239_v26 = vrot.slane %v238_v24, 4 }
 0x2b0   : > { %v240_v27 = vmax.f32 %v238_v24, %v239_v26  ;;  %v225_v28 = vmin.f32 %v223_v23, %v224_v25 }
 0x2b2   : > { %v241_v29 = vrot.slane %v240_v27, 2  ;;  %v226_v30 = vrot.slane %v225_v28, 1 }
 0x2b4   : > { %v242_v31 = vmax.f32 %v240_v27, %v241_v29  ;;  %v227_v32 = vmin.f32 %v225_v28, %v226_v30 }
 0x2b6   : > { %409 = vpush %v227_v32  ;;  %v243_v33 = vrot.slane %v242_v31, 1 }
 0x2b8   : > { %v244_v34 = vmax.f32 %v242_v31, %v243_v33 }
 0x2ba   : > { %411 = vpush %v244_v34 }
 0x2e7   : > { %s410_s27 = spop %409 }
 0x2e8   : > { %v229_v35 = vstv %s410_s27 }
 0x2eb   : > { %s412_s28 = spop %411 }
 0x2ec   : > { %v246_v36 = vstv %s412_s28 }
 0x2ed   : > { %v247_v37 = vsub.f32 %v246_v36, %v229_v35  ;;  %v252_v39 = vmin.f32 %v205_v63, %v246_v36  ;;  %v253_v40 = vmin.f32 %v206_v0, %v246_v36  ;;  %v254_v41 = vmin.f32 %v207_v1, %v246_v36 }
 0x2ee   : > { %v255_v42 = vmin.f32 %v208_v2, %v246_v36  ;;  %v256_v43 = vmin.f32 %v209_v3, %v246_v36  ;;  %v257_v44 = vmin.f32 %v210_v4, %v246_v36  ;;  %v258_v45 = vmin.f32 %v211_v5, %v246_v36 }
 0x2ef   : > { %vm248_vm2 = vcmp.gt.f32.partialorder %v247_v37, 1e-06  ;;  %v259_v46 = vmin.f32 %v212_v6, %v246_v36  ;;  %v260_v47 = vmax.f32 %v252_v39, %v229_v35  ;;  %v261_v48 = vmax.f32 %v253_v40, %v229_v35 }
 0x2f0   : > { %v249_v38 = vsel %vm248_vm2, %v247_v37, 1.0  ;;  %v262_v49 = vmax.f32 %v254_v41, %v229_v35  ;;  %v263_v50 = vmax.f32 %v255_v42, %v229_v35  ;;  %v264_v51 = vmax.f32 %v256_v43, %v229_v35 }
 0x2f1   : > { %467 = vrcp.f32 %v249_v38  ;;  %v265_v52 = vmax.f32 %v257_v44, %v229_v35  ;;  %v266_v53 = vmax.f32 %v258_v45, %v229_v35  ;;  %v267_v54 = vmax.f32 %v259_v46, %v229_v35 }
 0x2f2   : > { %v268_v55 = vsub.f32 %v260_v47, %v229_v35  ;;  %v269_v56 = vsub.f32 %v261_v48, %v229_v35  ;;  %v270_v57 = vsub.f32 %v262_v49, %v229_v35  ;;  %v271_v58 = vsub.f32 %v263_v50, %v229_v35 }
 0x2f3   : > { %v272_v60 = vsub.f32 %v264_v51, %v229_v35  ;;  %v273_v61 = vsub.f32 %v265_v52, %v229_v35  ;;  %v274_v62 = vsub.f32 %v266_v53, %v229_v35  ;;  %v275_v63 = vsub.f32 %v267_v54, %v229_v35 }
 0x2fb   : > { %v468_v59 = vpop.eup %467 }
 0x2fc   : > { %v276_v0 = vmul.f32 %v468_v59, %v268_v55  ;;  %v277_v1 = vmul.f32 %v468_v59, %v269_v56  ;;  %v278_v2 = vmul.f32 %v468_v59, %v270_v57  ;;  %v279_v3 = vmul.f32 %v468_v59, %v271_v58 }
 0x2fd   : > { %v280_v4 = vmul.f32 %v468_v59, %v272_v60  ;;  %v281_v5 = vmul.f32 %v468_v59, %v273_v61  ;;  %v282_v6 = vmul.f32 %v468_v59, %v274_v62  ;;  %v283_v7 = vmul.f32 %v468_v59, %v275_v63 }
 0x2fe   : > { %v286_v8 = vsel %vm248_vm2, %v276_v0, 0.0  ;;  %v287_v9 = vsel %vm248_vm2, %v277_v1, 0.0  ;;  %v288_v10 = vsel %vm248_vm2, %v278_v2, 0.0  ;;  %v289_v11 = vsel %vm248_vm2, %v279_v3, 0.0 }
 0x2ff   : > { %v290_v12 = vsel %vm248_vm2, %v280_v4, 0.0  ;;  %v291_v13 = vsel %vm248_vm2, %v281_v5, 0.0  ;;  %v292_v14 = vsel %vm248_vm2, %v282_v6, 0.0  ;;  %v293_v15 = vsel %vm248_vm2, %v283_v7, 0.0  ;;  %294 = vst [vmem:[%s701_s2] sm:$0xff] %v286_v8  ;;  %295 = vst [vmem:[%s701_s2 + $0x8] sm:$0xff] %v287_v9 }
 0x300   : > { %296 = vst [vmem:[%s701_s2 + $0x10] sm:$0xff] %v288_v10  ;;  %297 = vst [vmem:[%s701_s2 + $0x18] sm:$0xff] %v289_v11 }
 0x301   : > { %298 = vst [vmem:[%s701_s2 + $0x20] sm:$0xff] %v290_v12  ;;  %299 = vst [vmem:[%s701_s2 + $0x28] sm:$0xff] %v291_v13 }
 0x302   : > { %300 = vst [vmem:[%s701_s2 + $0x30] sm:$0xff] %v292_v14  ;;  %301 = vst [vmem:[%s701_s2 + $0x38] sm:$0xff] %v293_v15 }
 0x303   : > { %512 = shalt.err (!%p509_p2)
}
 0x304   : > { %s513_s21 = scalar_lea.hbm %s707_s5, 1024  ;;  %s517_s26 = scalar_lea.hbm %s770_s1, 2048 }
 0x305   : > { %p514_p4 = scmp.ne.s32.totalorder %s707_s5, %s513_s21  ;;  %p518_p9 = scmp.lt.u32.totalorder %s707_s5, %s770_s1 }
 0x306   : > { %p519_p1 = scmp.lt.u32.totalorder %s517_s26, %s513_s21  ;;  %p521_p6 = scmp.lt.u32.totalorder %s513_s21, %s707_s5 }
 0x307   : > { %p515_p5 = pnand %p514_p4, %p777_p11 }
 0x308   : > { %p520_p3 = por %p519_p1, %p518_p9 }
 0x309   : > { %p516_p7 = pneg %p515_p5 }
 0x30a   : > { %p522_p12 = por %p521_p6, %p520_p3 }
 0x30c   : > { %p523_p13 = pnand %p522_p12, %p516_p7 }
 0x30e   : > { %526 = shalt.err (!%p523_p13)
}
 0x30f   : > { %s571_s25 = smov 128   ;;  %s572_s27 = smov 8  }
 0x310   : > { %415 = dma.vmem_to_hbm [thread:$0]  (%p777_p11), %s709_s3, 1024, %s707_s5, %s303_s11, %s571_s25, %s571_s25, %s572_s27  }
 0x311 PF: > { %s331_s28 = sand.u32 1, %s553_s6   ;;  %p778_p8 = scmp.ne.s32.totalorder %s775_s19, 0 }
 0x312   : > { %p779_p10 = scmp.ge.s32.totalorder %s565_s9, 2  ;;  %s332_s29 = scalar_lea.sflag [#allocation4], %s331_s28 }
 0x314   : > { %p422_p0 = pnand %p779_p10, %p778_p8 }
 0x316   : > { %548 = dma.done.wait (!%p422_p0), %s332_s29, 1024  }
 0x317   : > { %550 = vsyncadd (!%p422_p0), %s332_s29, 4294966272  ;;  %p14_p2 = scmp.ge.s32.totalorder %s608_s12, 4   ;;  %s780_s6 = smov %s557_s7 }
 0x318   : > { %s781_s7 = smov %s561_s8  ;;  %s782_s8 = smov %s620_s15 }
 0x319   : > { %s783_s9 = smov %s608_s12  ;;  %16 = sbr.rel (!%p14_p2) target bundleno = 5 (0x5), region = 69 }
 0x320   :  { %337 = vsyncpa [#allocation3], 1 }
 0x321   :  { %339 = vsyncpa [#allocation3 + $0x1], 1 }
 0x322   :  { %340 = vsyncpa [#allocation4], 1 }
 0x323   :  { %342 = vsyncpa [#allocation4 + $0x1], 1 }

</bundles_post_ra>
